<compile_context>
chip_gen: v6e
topology: v6e:2x2x1
jax: 0.10.0
libtpu: 0.0.40
codegen_flags: <defaults>
</compile_context>

<pallas_src>
import math

import jax
import jax.numpy as jnp
from jax.experimental import pallas as pl
from jax.experimental.pallas import tpu as pltpu


_MAX_BLOCK_BYTES = 4 * 1024 * 1024   # per output block (x2 when double-buffered)
_LAZY_BYPASS_BYTES = 1 << 20         # below this, skip Pallas entirely (auto mode)
_V7X_BALANCE_BYTES = 4 << 20         # above this, force >= 2 batch tiles


def _sublane_multiple(dtype) -> int:
    # Packed-dtype sublane granularity: f32 -> 8, bf16 -> 16, int8/fp8 -> 32.
    return max(8, 32 // jnp.dtype(dtype).itemsize)


def _broadcast_kernel(const_ref, out_ref):
    # const_ref: (1, ...) constant block (same block every grid step).
    # out_ref:   (TB, ...) batch tile -> replicate the constant across TB rows.
    out_ref[...] = jnp.broadcast_to(const_ref[...], out_ref.shape)


def _forward_rank1(constant, batch_size, d, dtype, itemsize, out_bytes):
    """inner rank 1: output (B, D); batch is the sublane dim of the block."""
    mult = _sublane_multiple(dtype)
    row_bytes = max(d * itemsize, 1)
    tb = max(1, _MAX_BLOCK_BYTES // row_bytes)
    if out_bytes >= _V7X_BALANCE_BYTES and batch_size >= 2:
        tb = min(tb, pl.cdiv(batch_size, 2))       # keep both v7x TCs busy
    if tb >= batch_size:
        tb = batch_size                            # full dim -> always legal
    else:
        tb = max(mult, (tb // mult) * mult)        # dtype-aware sublane multiple
        tb = min(tb, batch_size)
    grid = (pl.cdiv(batch_size, tb),)

    return pl.pallas_call(
        _broadcast_kernel,
        out_shape=jax.ShapeDtypeStruct((batch_size, d), dtype),
        grid_spec=pltpu.PrefetchScalarGridSpec(
            num_scalar_prefetch=0,
            grid=grid,
            in_specs=[pl.BlockSpec((1, d), lambda i: (0, 0))],
            out_specs=pl.BlockSpec((tb, d), lambda i: (i, 0)),
        ),
        compiler_params=pltpu.CompilerParams(dimension_semantics=("parallel",)),
        cost_estimate=pl.CostEstimate(
            flops=0, transcendentals=0, bytes_accessed=out_bytes + row_bytes),
    )(constant)


def _forward_rankn(constant, batch_size, inner, dtype, itemsize, out_bytes):
    """inner rank >= 2: output (B, *inner) written in its native layout."""
    c = inner[0]
    tail = inner[1:]
    n_tail = len(tail)
    tail_bytes = max(math.prod(tail) * itemsize, 1)
    row_bytes = c * tail_bytes

    if row_bytes <= _MAX_BLOCK_BYTES:
        tc = c                                     # keep the whole constant per step
        tb = max(1, _MAX_BLOCK_BYTES // row_bytes)
    else:
        tb = 1
        tc = max(1, _MAX_BLOCK_BYTES // tail_bytes)
        if n_tail == 1 and tc < c:
            # tc is the sublane dim of the block -> dtype-aware multiple.
            mult = _sublane_multiple(dtype)
            tc = max(mult, (tc // mult) * mult)
        tc = min(tc, c)
        # TODO(synk): if a single inner[0] slice still exceeds the budget, also tile
        # the trailing (8,128) dims; not needed for realistic generator constants.

    if out_bytes >= _V7X_BALANCE_BYTES and batch_size >= 2:
        tb = min(tb, pl.cdiv(batch_size, 2))       # >=2 balanced tiles for v7x TCs
    tb = max(1, min(tb, batch_size))

    in_block = (1, tc) + tail
    out_block = (tb, tc) + tail

    def in_map(i, j):
        return (0, j) + (0,) * n_tail

    def out_map(i, j):
        return (i, j) + (0,) * n_tail

    grid = (pl.cdiv(batch_size, tb), pl.cdiv(c, tc))

    return pl.pallas_call(
        _broadcast_kernel,
        out_shape=jax.ShapeDtypeStruct((batch_size,) + inner, dtype),
        grid_spec=pltpu.PrefetchScalarGridSpec(
            num_scalar_prefetch=0,
            grid=grid,
            in_specs=[pl.BlockSpec(in_block, in_map)],
            out_specs=pl.BlockSpec(out_block, out_map),
        ),
        compiler_params=pltpu.CompilerParams(
            dimension_semantics=("parallel", "parallel")),
        cost_estimate=pl.CostEstimate(
            flops=0, transcendentals=0, bytes_accessed=out_bytes + row_bytes),
    )(constant)


def constant_forward(constant: jax.Array, batch_size: int, *, materialize="auto") -> jax.Array:
    """Expand `constant` of shape (1, *shape) to (batch_size, *shape)."""
    assert constant.shape[0] == 1
    inner = tuple(constant.shape[1:])
    dtype = constant.dtype
    itemsize = jnp.dtype(dtype).itemsize
    out_shape = (batch_size,) + inner
    out_bytes = batch_size * (math.prod(inner) if inner else 1) * itemsize

    if materialize == "auto":
        # Tiny outputs: launch/per-step overhead dominates -> lazy broadcast.
        materialize = out_bytes >= _LAZY_BYPASS_BYTES
    if not materialize or len(inner) == 0:
        # Zero HBM traffic; XLA fuses the broadcast into the consumer.
        return jnp.broadcast_to(constant, out_shape)

    if len(inner) == 1:
        return _forward_rank1(constant, batch_size, inner[0], dtype, itemsize, out_bytes)
    return _forward_rankn(constant, batch_size, inner, dtype, itemsize, out_bytes)


class ConstantPallas:
    """JAX/Pallas port of the PyTorch `Constant` module."""

    def __init__(self, *shape, dtype=jnp.float32):
        # nn.Parameter(torch.ones(1, *shape)) -> deterministic ones init.
        self.constant = jnp.ones((1,) + tuple(shape), dtype=dtype)

    def __call__(self, batch_size: int, materialize="auto") -> jax.Array:
        return constant_forward(self.constant, batch_size, materialize=materialize)


if __name__ == "__main__":
    # Small shapes consistent with a generator constant: (C, H, W) = (4, 16, 16).
    key = jax.random.PRNGKey(0)
    C, H, W = 4, 16, 16
    module = ConstantPallas(C, H, W)
    # Simulate a trained parameter so the replication check is non-trivial.
    module.constant = jax.random.normal(key, (1, C, H, W), dtype=jnp.float32)

    ok = True
    for batch_size in (2, 5):
        # Force the Pallas path so the kernel is exercised at small shapes.
        out = jax.block_until_ready(module(batch_size, materialize=True))
        ref = jnp.broadcast_to(module.constant, (batch_size, C, H, W))
        ok &= out.shape == (batch_size, C, H, W)
        ok &= out.dtype == module.constant.dtype
        ok &= bool(jnp.all(out == ref))

    # Default "auto" path: tiny output -> lazy broadcast bypass (no kernel launch).
    out_auto = jax.block_until_ready(module(3))
    ok &= bool(jnp.all(out_auto == jnp.broadcast_to(module.constant, (3, C, H, W))))

    assert ok
    print("KERNEL_OK")
</pallas_src>

<mosaic_0001>
module attributes {stable_mosaic.version = 11 : i64} {
  func.func @_broadcast_kernel(%arg0: i32, %arg1: i32, %arg2: memref<1x4x16x16xf32, #tpu.memory_space<vmem>>, %arg3: memref<2x4x16x16xf32, #tpu.memory_space<vmem>>) attributes {dimension_semantics = [#tpu.dimension_semantics<parallel>, #tpu.dimension_semantics<parallel>], iteration_bounds = array<i64: 1, 1>, scalar_prefetch = 0 : i64, scratch_operands = 0 : i64, tpu.core_type = #tpu.core_type<tc>, window_params = [{transform_indices = @transform_0, window_bounds = array<i64: 1, 4, 16, 16>}, {transform_indices = @transform_1, window_bounds = array<i64: 2, 4, 16, 16>}]} {
    %c0 = arith.constant 0 : index
    %c0_0 = arith.constant 0 : index
    %c0_1 = arith.constant 0 : index
    %c0_2 = arith.constant 0 : index
    %0 = vector.load %arg2[%c0, %c0_0, %c0_1, %c0_2] : memref<1x4x16x16xf32, #tpu.memory_space<vmem>>, vector<1x4x16x16xf32>
    %1 = vector.shape_cast %0 : vector<1x4x16x16xf32> to vector<1x4x16x16xf32>
    %2 = vector.broadcast %1 : vector<1x4x16x16xf32> to vector<2x4x16x16xf32>
    %c0_3 = arith.constant 0 : index
    %c0_4 = arith.constant 0 : index
    %c0_5 = arith.constant 0 : index
    %c0_6 = arith.constant 0 : index
    %3 = vector.load %arg3[%c0_3, %c0_4, %c0_5, %c0_6] : memref<2x4x16x16xf32, #tpu.memory_space<vmem>>, vector<2x4x16x16xf32>
    tpu.vector_store %arg3[%c0_3, %c0_4, %c0_5, %c0_6], %2 {strides = array<i32>} : memref<2x4x16x16xf32, #tpu.memory_space<vmem>>, vector<2x4x16x16xf32>,
    return
  }
  func.func @transform_0(%arg0: i32, %arg1: i32) -> (i32, i32, i32, i32) {
    %c0_i32 = arith.constant 0 : i32
    %c0_i32_0 = arith.constant 0 : i32
    %c0_i32_1 = arith.constant 0 : i32
    %c0_i32_2 = arith.constant 0 : i32
    return %c0_i32, %arg1, %c0_i32_0, %c0_i32_1 : i32, i32, i32, i32
  }
  func.func @transform_1(%arg0: i32, %arg1: i32) -> (i32, i32, i32, i32) {
    %c0_i32 = arith.constant 0 : i32
    %c0_i32_0 = arith.constant 0 : i32
    %c0_i32_1 = arith.constant 0 : i32
    return %arg0, %arg1, %c0_i32, %c0_i32_0 : i32, i32, i32, i32
  }
}

</mosaic_0001>

<bundles_post_ra>
// kernel: tpu_custom_call.1
= control target key start
LH: loop header
LB: loop body
LE: loop exit
PB: predicated region body
PF: predicated region fallthrough
CT: control target
= control target key end

     0   :  { %6 = vsyncpa [#allocation3], 0  ;;  %s155_s0 = inlined_call_operand.hbm [shape: f32[1,4,16,16], index: 0, kind: input, shape index: {}]   ;;  %s156_s1 = inlined_call_operand.hbm [shape: f32[2,4,16,16], index: 1, kind: output, shape index: {}]  }
   0x1   :  { %7 = vsyncpa [#allocation4], 0  ;;  %s113_s6 = smov [#allocation2]  }
   0x2   :  { %s13_s7 = sshll.u32 %s113_s6, 4  ;;  %s14_s7 = int_to_ptr.vmem [resolvable:$true] %s13_s7 }
   0x3   :  { %s77_s8 = scalar_lea.vmem %s14_s7, 1024  ;;  %p82_p1 = scmp.lt.s32.totalorder %s14_s7, %s14_s7 }
   0x4   :  { %p78_p0 = scmp.ne.s32.totalorder %s14_s7, %s77_s8  ;;  %p83_p2 = scmp.lt.s32.totalorder %s77_s8, %s77_s8 }
   0x6   :  { %p84_p3 = por %p83_p2, %p82_p1 }
   0x8   :  { %p85_p4 = pnand %p84_p3, %p78_p0 }
   0xa   :  { %88 = shalt.err (!%p85_p4)
}
   0xb   :  { %s114_s9 = smov 128   ;;  %s115_s10 = smov 8  }
   0xc   :  { %19 = dma.hbm_to_vmem [thread:$0]  %s155_s0, 1024, %s14_s7, [#allocation3], %s114_s9, %s114_s9, %s115_s10  }
   0xd   :  { %109 = dma.done.wait [#allocation3], 1024  }
   0xe   :  { %110 = vsyncadd [#allocation3], 4294966272  ;;  %vm31_vm0 = vcmask 130048   ;;  %s116_s13 = smov [#allocation5]   ;;  %v23_v0 = vld [vmem:[#allocation2] sm:$0xff]  ;;  %v24_v1 = vld [vmem:[#allocation2 + $0x8] sm:$0xff] }
   0xf   :  { %s53_s14 = sshll.u32 %s116_s13, 4  ;;  %v25_v2 = vld [vmem:[#allocation2 + $0x10] sm:$0xff]  ;;  %32 = vst.msk [vmem:[#allocation5] sm:$0xff] %vm31_vm0, %v23_v0  ;;  %40 = vst.msk [vmem:[#allocation5 + $0x40] sm:$0xff] %vm31_vm0, %v23_v0  ;;  %v26_v3 = vld [vmem:[#allocation2 + $0x18] sm:$0xff]  ;;  %s54_s14 = int_to_ptr.vmem [resolvable:$true] %s53_s14 }
  0x10   :  { %33 = vst.msk [vmem:[#allocation5 + $0x8] sm:$0xff] %vm31_vm0, %v24_v1  ;;  %41 = vst.msk [vmem:[#allocation5 + $0x48] sm:$0xff] %vm31_vm0, %v24_v1  ;;  %v27_v4 = vld [vmem:[#allocation2 + $0x20] sm:$0xff]  ;;  %v28_v5 = vld [vmem:[#allocation2 + $0x28] sm:$0xff]  ;;  %s89_s0 = scalar_lea.vmem %s54_s14, 2048  ;;  %p94_p6 = scmp.lt.s32.totalorder %s54_s14, %s54_s14 }
  0x11   :  { %34 = vst.msk [vmem:[#allocation5 + $0x10] sm:$0xff] %vm31_vm0, %v25_v2  ;;  %42 = vst.msk [vmem:[#allocation5 + $0x50] sm:$0xff] %vm31_vm0, %v25_v2  ;;  %v29_v6 = vld [vmem:[#allocation2 + $0x30] sm:$0xff]  ;;  %v30_v7 = vld [vmem:[#allocation2 + $0x38] sm:$0xff]  ;;  %p90_p5 = scmp.ne.s32.totalorder %s54_s14, %s89_s0  ;;  %p95_p7 = scmp.lt.s32.totalorder %s89_s0, %s89_s0 }
  0x12   :  { %35 = vst.msk [vmem:[#allocation5 + $0x18] sm:$0xff] %vm31_vm0, %v26_v3  ;;  %43 = vst.msk [vmem:[#allocation5 + $0x58] sm:$0xff] %vm31_vm0, %v26_v3 }
  0x13   :  { %36 = vst.msk [vmem:[#allocation5 + $0x20] sm:$0xff] %vm31_vm0, %v27_v4  ;;  %44 = vst.msk [vmem:[#allocation5 + $0x60] sm:$0xff] %vm31_vm0, %v27_v4  ;;  %p96_p8 = por %p95_p7, %p94_p6 }
  0x14   :  { %37 = vst.msk [vmem:[#allocation5 + $0x28] sm:$0xff] %vm31_vm0, %v28_v5  ;;  %45 = vst.msk [vmem:[#allocation5 + $0x68] sm:$0xff] %vm31_vm0, %v28_v5 }
  0x15   :  { %38 = vst.msk [vmem:[#allocation5 + $0x30] sm:$0xff] %vm31_vm0, %v29_v6  ;;  %46 = vst.msk [vmem:[#allocation5 + $0x70] sm:$0xff] %vm31_vm0, %v29_v6  ;;  %p97_p9 = pnand %p96_p8, %p90_p5 }
  0x16   :  { %39 = vst.msk [vmem:[#allocation5 + $0x38] sm:$0xff] %vm31_vm0, %v30_v7  ;;  %47 = vst.msk [vmem:[#allocation5 + $0x78] sm:$0xff] %vm31_vm0, %v30_v7 }
  0x17   :  { %100 = shalt.err (!%p97_p9)
}
  0x18   :  { %59 = dma.vmem_to_hbm [thread:$0]  %s54_s14, 2048, %s156_s1, [#allocation4], %s114_s9, %s114_s9, %s115_s10  }
  0x19   :  { %111 = dma.done.wait [#allocation4], 2048  }
  0x1a   :  { %112 = vsyncadd [#allocation4], 4294965248 }
  0x1b   :  { %63 = vsyncpa [#allocation3], 1 }
  0x1c   :  { %64 = vsyncpa [#allocation4], 1 }

</bundles_post_ra>
